<compile_context>
chip_gen: v6e
topology: v6e:2x2x1
jax: 0.10.0
libtpu: 0.0.40
codegen_flags: <defaults>
</compile_context>

<pallas_src>
import jax
import jax.numpy as jnp
from jax.experimental import pallas as pl
from jax.experimental.pallas import tpu as pltpu

_EPS = 1e-8
LANE = 128
SUBLANE = 8


def _round_up(x, m):
    return ((x + m - 1) // m) * m


def _acos_poly(d):
    """acos(d) for d in [0, 0.99]: Abramowitz&Stegun 4.4.46 + one Newton step.

    Avoids relying on an arccos lowering inside the kernel; only needs
    sqrt / sin / cos.  Runs on the per-lane (1, M_TILE) data only, so its cost
    is ~1/T of the kernel.
    """
    dc = jnp.clip(d, 0.0, 0.99)
    poly = (((((((-0.0012624911 * dc + 0.0066700901) * dc - 0.0170881256) * dc
                + 0.0308918810) * dc - 0.0501743046) * dc + 0.0889789874) * dc
             - 0.2145988016) * dc + 1.5707963050)
    w = jnp.sqrt(1.0 - dc) * poly
    # Newton refinement on cos(w) = dc  (sin(w) >= 0.14 since dc <= 0.99)
    w = w + (jnp.cos(w) - dc) / jnp.maximum(jnp.sin(w), 1e-6)
    return w


def _interp_kernel(w_ref, packed_ref, rot6d_ref, pos_ref):
    # w_ref:      (T, 1)    interpolation weights (vary along sublanes only)
    # packed_ref: (16, Mt)  rows 0-3 start quat, 4-7 end quat, 8-10 start root
    #                       pos, 11-13 end root pos, 14-15 padding
    # rot6d_ref:  (6, T, Mt) output 6d rotations
    # pos_ref:    (3, T, Mt) output positions
    w = w_ref[...]                                   # (T, 1)
    one_m_w = 1.0 - w

    # ---- per-lane quantities, computed ONCE per block: shape (1, Mt) ----
    s0 = packed_ref[0:1, :]
    s1 = packed_ref[1:2, :]
    s2 = packed_ref[2:3, :]
    s3 = packed_ref[3:4, :]
    e0 = packed_ref[4:5, :]
    e1 = packed_ref[5:6, :]
    e2 = packed_ref[6:7, :]
    e3 = packed_ref[7:8, :]

    # normalize (torch: x / (||x|| + eps)) -> one divide + 4 muls per quat
    inv_ns = 1.0 / (jnp.sqrt(s0 * s0 + s1 * s1 + s2 * s2 + s3 * s3) + _EPS)
    inv_ne = 1.0 / (jnp.sqrt(e0 * e0 + e1 * e1 + e2 * e2 + e3 * e3) + _EPS)
    s0, s1, s2, s3 = s0 * inv_ns, s1 * inv_ns, s2 * inv_ns, s3 * inv_ns
    e0, e1, e2, e3 = e0 * inv_ne, e1 * inv_ne, e2 * inv_ne, e3 * inv_ne

    dot = s0 * e0 + s1 * e1 + s2 * e2 + s3 * e3
    flip = jnp.where(dot < 0.0, -1.0, 1.0)
    e0, e1, e2, e3 = e0 * flip, e1 * flip, e2 * flip, e3 * flip
    dot = jnp.abs(dot)

    # Fold the "nearly parallel" branch into the per-lane setup: when
    # dot > 0.99 use a tiny omega so that sin(a*omega) * (1/sin(omega)) == a
    # to f32 accuracy; the dense (T, Mt) path then needs no selects at all.
    linear = (1.0 - dot) < 0.01                      # (1, Mt)
    omega = jnp.where(linear, 1e-4, _acos_poly(dot))
    inv_sin = 1.0 / jnp.maximum(jnp.sin(omega), 1e-7)

    # ---- dense (T, Mt) SLERP coefficients via broadcasting ----
    a0 = jnp.sin(one_m_w * omega) * inv_sin
    a1 = jnp.sin(w * omega) * inv_sin

    r = a0 * s0 + a1 * e0
    i = a0 * s1 + a1 * e1
    j = a0 * s2 + a1 * e2
    k = a0 * s3 + a1 * e3

    # ---- quaternion (r,i,j,k) -> rotation matrix -> 6d (first two rows) ----
    n2 = r * r + i * i + j * j + k * k
    inv_n2 = pl.reciprocal(n2, approx=True)
    inv_n2 = inv_n2 * (2.0 - n2 * inv_n2)            # Newton step -> ~f32 accuracy
    two_s = inv_n2 + inv_n2
    ii = i * i
    jj = j * j
    kk = k * k
    ij = i * j
    ik = i * k
    jk = j * k
    kr = k * r
    jr = j * r
    ir = i * r
    rot6d_ref[0, :, :] = 1.0 - two_s * (jj + kk)     # m00
    rot6d_ref[1, :, :] = two_s * (ij - kr)           # m01
    rot6d_ref[2, :, :] = two_s * (ik + jr)           # m02
    rot6d_ref[3, :, :] = two_s * (ij + kr)           # m10
    rot6d_ref[4, :, :] = 1.0 - two_s * (ii + kk)     # m11
    rot6d_ref[5, :, :] = two_s * (jk - ir)           # m12

    # ---- root position LERP broadcast across T (dense slab stores) ----
    for c in range(3):
        pc_s = packed_ref[8 + c:9 + c, :]
        pc_e = packed_ref[11 + c:12 + c, :]
        pos_ref[c, :, :] = pc_s + w * (pc_e - pc_s)


def _vmem_budget():
    """Per-chip VMEM budget (bytes) for tile sizing + matching scoped limit."""
    cap = 128 * 1024 * 1024
    try:
        info = pltpu.get_tpu_info()
        cap = int(getattr(info, "vmem_capacity_bytes", cap))
    except Exception:
        pass
    # ~30% of physical capacity for the working set (double-buffered outputs +
    # dense intermediates), capped at 24 MiB (plenty even on v5e's 0.8 TB/s).
    budget = min(24 << 20, max(6 << 20, int(cap * 0.30)))
    vmem_limit = int(min(cap * 0.5, 64 << 20))
    return budget, vmem_limit


def interpolator_forward(input_data, nb_joints):
    """JAX/Pallas equivalent of Interpolator.forward for space='ortho6d'.

    input_data keys (jnp arrays):
      'joint_rotations'      (B, T_total, J, 4) quaternions (r,i,j,k)
      'root_positions'       (B, T_total, 3)
      'past_frame_indices'   (n_past,)   int32
      'future_frame_indices' (n_future,) int32
      'target_frame_indices' (n_trans,)  int32
    Returns (joint_positions (B,n_trans,J,3), joint_rotations_6d (B,n_trans,J,6)).

    Note: frame indices are read with int(...) (concrete values) -> the
    function recompiles per index configuration, like the torch module's
    Python-level indexing.
    """
    rotations = input_data['joint_rotations']
    root_positions = input_data['root_positions']
    target_idx = input_data['target_frame_indices']

    n_trans = int(target_idx.shape[0])
    past_i = int(input_data['past_frame_indices'][-1])
    future_i = int(input_data['future_frame_indices'][0]) - n_trans

    B, _, J, _ = rotations.shape
    T = n_trans
    M = B * J

    # interpolation weights (tiny, plain JAX)
    tt = target_idx.astype(jnp.float32)
    weights = tt - tt[0] + 1.0
    weights = weights / (weights[-1] + 1.0)

    start_q = rotations[:, past_i].astype(jnp.float32).reshape(M, 4)   # (M, 4)
    end_q = rotations[:, future_i].astype(jnp.float32).reshape(M, 4)   # (M, 4)
    start_r = root_positions[:, past_i].astype(jnp.float32)            # (B, 3)
    end_r = root_positions[:, future_i].astype(jnp.float32)            # (B, 3)
    ps = jnp.broadcast_to(start_r[:, None, :], (B, J, 3)).reshape(M, 3)
    pe = jnp.broadcast_to(end_r[:, None, :], (B, J, 3)).reshape(M, 3)

    # ---- per-chip tile sizing (v5e / v6e / v7x) ----
    t_pad = _round_up(T, SUBLANE)
    lanes = _round_up(M, LANE)
    budget, vmem_limit = _vmem_budget()
    # bytes of VMEM per lane of m_tile:
    #   2x double-buffered outputs (9 ch * t_pad * 4B), ~12 dense f32
    #   intermediates (48 * t_pad), double-buffered packed input (2*16*4B).
    per_lane = (72 + 48) * t_pad + 128
    m_tile = max(LANE, min((budget // per_lane) // LANE * LANE, lanes))
    # Megacore: give the second TensorCore an equal, LARGE block when there is
    # enough data; never shrink below ~1024 lanes just to manufacture 2 steps.
    if m_tile >= lanes and lanes >= 2 * 8 * LANE:
        m_tile = _round_up((lanes + 1) // 2, LANE)
    m_pad = _round_up(lanes, m_tile)

    # ---- one packed component-major input at its natural (B*J) extent ----
    # (the T-fold broadcast is never materialized in HBM)
    packed = jnp.zeros((16, m_pad), jnp.float32)
    packed = packed.at[0, :].set(1.0)      # identity quats in padded lanes
    packed = packed.at[4, :].set(1.0)
    packed = packed.at[0:4, :M].set(start_q.T)
    packed = packed.at[4:8, :M].set(end_q.T)
    packed = packed.at[8:11, :M].set(ps.T)
    packed = packed.at[11:14, :M].set(pe.T)

    w_col = jnp.zeros((t_pad, 1), jnp.float32).at[:T, 0].set(weights)

    grid = (m_pad // m_tile,)
    cost = pl.CostEstimate(
        flops=60 * t_pad * m_pad,
        transcendentals=2 * t_pad * m_pad,
        bytes_accessed=(9 * t_pad + 16) * m_pad * 4 + t_pad * 4,
    )
    rot6d_cm, pos_cm = pl.pallas_call(
        _interp_kernel,
        out_shape=(jax.ShapeDtypeStruct((6, t_pad, m_pad), jnp.float32),
                   jax.ShapeDtypeStruct((3, t_pad, m_pad), jnp.float32)),
        grid=grid,
        in_specs=[pl.BlockSpec((t_pad, 1), lambda n: (0, 0)),       # weights
                  pl.BlockSpec((16, m_tile), lambda n: (0, n))],    # packed qs/qe/ps/pe
        out_specs=(pl.BlockSpec((6, t_pad, m_tile), lambda n: (0, 0, n)),
                   pl.BlockSpec((3, t_pad, m_tile), lambda n: (0, 0, n))),
        compiler_params=pltpu.CompilerParams(
            dimension_semantics=("parallel",),
            vmem_limit_bytes=vmem_limit),
        cost_estimate=cost,
    )(w_col, packed)

    # Final layout plumbing to the module's (B, T, J, C) output format.
    # When T % 8 == 0 and M % m_tile == 0 the slices are views; otherwise XLA
    # fuses slice + transpose into a single copy.
    rot6d = rot6d_cm[:, :T, :M].reshape(6, T, B, J).transpose(2, 1, 3, 0)  # (B,T,J,6)
    pos = pos_cm[:, :T, :M].reshape(3, T, B, J).transpose(2, 1, 3, 0)      # (B,T,J,3)
    return pos, rot6d


def _reference_forward(input_data, nb_joints):
    """Pure-jnp reference mirroring the torch module (for verification)."""
    rotations = input_data['joint_rotations'].astype(jnp.float32)
    root_positions = input_data['root_positions'].astype(jnp.float32)
    target_idx = input_data['target_frame_indices']
    n_trans = int(target_idx.shape[0])
    past_i = int(input_data['past_frame_indices'][-1])
    future_i = int(input_data['future_frame_indices'][0]) - n_trans

    tt = target_idx.astype(jnp.float32)
    w = tt - tt[0] + 1.0
    w = w / (w[-1] + 1.0)

    sq = rotations[:, past_i]
    eq = rotations[:, future_i]
    sr = root_positions[:, past_i]
    er = root_positions[:, future_i]

    def normalize(x):
        return x / (jnp.sqrt(jnp.sum(x * x, -1, keepdims=True)) + _EPS)

    sq = normalize(sq)
    eq = normalize(eq)
    B, J, _ = sq.shape
    T = n_trans
    sqb = jnp.broadcast_to(sq[:, None], (B, T, J, 4))
    eqb = jnp.broadcast_to(eq[:, None], (B, T, J, 4))
    wb = w[None, :, None, None]

    dot = jnp.sum(sqb * eqb, -1, keepdims=True)
    neg = dot < 0
    eqb = jnp.where(neg, -eqb, eqb)
    dot = jnp.where(neg, -dot, dot)
    linear = (1.0 - dot) < 0.01
    omega = jnp.arccos(jnp.clip(dot, -1.0, 1.0))
    so = jnp.where(linear, 1.0, jnp.sin(omega))
    a0 = jnp.where(linear, 1.0 - wb, jnp.sin((1.0 - wb) * omega) / so)
    a1 = jnp.where(linear, wb, jnp.sin(wb * omega) / so)
    q = a0 * sqb + a1 * eqb

    r, i, j, k = q[..., 0], q[..., 1], q[..., 2], q[..., 3]
    two_s = 2.0 / jnp.sum(q * q, -1)
    rot6d = jnp.stack([1 - two_s * (j * j + k * k), two_s * (i * j - k * r),
                       two_s * (i * k + j * r), two_s * (i * j + k * r),
                       1 - two_s * (i * i + k * k), two_s * (j * k - i * r)], -1)
    pos = sr[:, None, None, :] + wb * (er - sr)[:, None, None, :]
    pos = jnp.broadcast_to(pos, (B, T, nb_joints, 3))
    return pos, rot6d


if __name__ == "__main__":
    key = jax.random.PRNGKey(0)
    B, T_total, J, n_trans = 2, 16, 4, 8
    k1, k2 = jax.random.split(key)

    input_data = {
        'joint_rotations': jax.random.normal(k1, (B, T_total, J, 4), jnp.float32),
        'root_positions': jax.random.normal(k2, (B, T_total, 3), jnp.float32),
        'past_frame_indices': jnp.array([0, 1], jnp.int32),
        'future_frame_indices': jnp.array([18], jnp.int32),  # future_i = 18 - 8 = 10
        'target_frame_indices': jnp.arange(2, 2 + n_trans, dtype=jnp.int32),
    }

    pos, rot6d = interpolator_forward(input_data, nb_joints=J)
    jax.block_until_ready((pos, rot6d))

    pos_ref, rot6d_ref = _reference_forward(input_data, nb_joints=J)
    assert pos.shape == (B, n_trans, J, 3) and rot6d.shape == (B, n_trans, J, 6)
    assert jnp.allclose(pos, pos_ref, atol=2e-4, rtol=2e-4), "position mismatch"
    assert jnp.allclose(rot6d, rot6d_ref, atol=2e-4, rtol=2e-4), "rot6d mismatch"
    print("KERNEL_OK")
</pallas_src>

<mosaic_0001>
module attributes {stable_mosaic.version = 11 : i64} {
  func.func @_interp_kernel(%arg0: i32, %arg1: memref<8x1xf32, #tpu.memory_space<vmem>>, %arg2: memref<16x128xf32, #tpu.memory_space<vmem>>, %arg3: memref<6x8x128xf32, #tpu.memory_space<vmem>>, %arg4: memref<3x8x128xf32, #tpu.memory_space<vmem>>) attributes {dimension_semantics = [#tpu.dimension_semantics<parallel>], iteration_bounds = array<i64: 1>, scalar_prefetch = 0 : i64, scratch_operands = 0 : i64, tpu.core_type = #tpu.core_type<tc>, window_params = [{pipeline_mode = #tpu.pipeline_mode<synchronous>, transform_indices = @transform_0, window_bounds = array<i64: 8, 1>}, {transform_indices = @transform_1, window_bounds = array<i64: 16, 128>}, {transform_indices = @transform_2, window_bounds = array<i64: 6, 8, 128>}, {transform_indices = @transform_3, window_bounds = array<i64: 3, 8, 128>}]} {
    %c0 = arith.constant 0 : index
    %c0_0 = arith.constant 0 : index
    %0 = vector.load %arg1[%c0, %c0_0] : memref<8x1xf32, #tpu.memory_space<vmem>>, vector<8x1xf32>
    %cst = arith.constant 1.000000e+00 : f32
    %1 = vector.broadcast %cst : f32 to vector<8x1xf32>
    %2 = arith.subf %1, %0 : vector<8x1xf32>
    %c0_1 = arith.constant 0 : index
    %c0_2 = arith.constant 0 : index
    %3 = vector.load %arg2[%c0_1, %c0_2] : memref<16x128xf32, #tpu.memory_space<vmem>>, vector<1x128xf32>
    %c1 = arith.constant 1 : index
    %c0_3 = arith.constant 0 : index
    %4 = vector.load %arg2[%c1, %c0_3] : memref<16x128xf32, #tpu.memory_space<vmem>>, vector<1x128xf32>
    %c2 = arith.constant 2 : index
    %c0_4 = arith.constant 0 : index
    %5 = vector.load %arg2[%c2, %c0_4] : memref<16x128xf32, #tpu.memory_space<vmem>>, vector<1x128xf32>
    %c3 = arith.constant 3 : index
    %c0_5 = arith.constant 0 : index
    %6 = vector.load %arg2[%c3, %c0_5] : memref<16x128xf32, #tpu.memory_space<vmem>>, vector<1x128xf32>
    %c4 = arith.constant 4 : index
    %c0_6 = arith.constant 0 : index
    %7 = vector.load %arg2[%c4, %c0_6] : memref<16x128xf32, #tpu.memory_space<vmem>>, vector<1x128xf32>
    %c5 = arith.constant 5 : index
    %c0_7 = arith.constant 0 : index
    %8 = vector.load %arg2[%c5, %c0_7] : memref<16x128xf32, #tpu.memory_space<vmem>>, vector<1x128xf32>
    %c6 = arith.constant 6 : index
    %c0_8 = arith.constant 0 : index
    %9 = vector.load %arg2[%c6, %c0_8] : memref<16x128xf32, #tpu.memory_space<vmem>>, vector<1x128xf32>
    %c7 = arith.constant 7 : index
    %c0_9 = arith.constant 0 : index
    %10 = vector.load %arg2[%c7, %c0_9] : memref<16x128xf32, #tpu.memory_space<vmem>>, vector<1x128xf32>
    %11 = arith.mulf %3, %3 : vector<1x128xf32>
    %12 = arith.mulf %4, %4 : vector<1x128xf32>
    %13 = arith.addf %11, %12 : vector<1x128xf32>
    %14 = arith.mulf %5, %5 : vector<1x128xf32>
    %15 = arith.addf %13, %14 : vector<1x128xf32>
    %16 = arith.mulf %6, %6 : vector<1x128xf32>
    %17 = arith.addf %15, %16 : vector<1x128xf32>
    %18 = math.sqrt %17 : vector<1x128xf32>
    %cst_10 = arith.constant 9.99999993E-9 : f32
    %19 = vector.broadcast %cst_10 : f32 to vector<1x128xf32>
    %20 = arith.addf %18, %19 : vector<1x128xf32>
    %cst_11 = arith.constant 1.000000e+00 : f32
    %21 = vector.broadcast %cst_11 : f32 to vector<1x128xf32>
    %22 = arith.divf %21, %20 : vector<1x128xf32>
    %23 = arith.mulf %7, %7 : vector<1x128xf32>
    %24 = arith.mulf %8, %8 : vector<1x128xf32>
    %25 = arith.addf %23, %24 : vector<1x128xf32>
    %26 = arith.mulf %9, %9 : vector<1x128xf32>
    %27 = arith.addf %25, %26 : vector<1x128xf32>
    %28 = arith.mulf %10, %10 : vector<1x128xf32>
    %29 = arith.addf %27, %28 : vector<1x128xf32>
    %30 = math.sqrt %29 : vector<1x128xf32>
    %cst_12 = arith.constant 9.99999993E-9 : f32
    %31 = vector.broadcast %cst_12 : f32 to vector<1x128xf32>
    %32 = arith.addf %30, %31 : vector<1x128xf32>
    %cst_13 = arith.constant 1.000000e+00 : f32
    %33 = vector.broadcast %cst_13 : f32 to vector<1x128xf32>
    %34 = arith.divf %33, %32 : vector<1x128xf32>
    %35 = arith.mulf %3, %22 : vector<1x128xf32>
    %36 = arith.mulf %4, %22 : vector<1x128xf32>
    %37 = arith.mulf %5, %22 : vector<1x128xf32>
    %38 = arith.mulf %6, %22 : vector<1x128xf32>
    %39 = arith.mulf %7, %34 : vector<1x128xf32>
    %40 = arith.mulf %8, %34 : vector<1x128xf32>
    %41 = arith.mulf %9, %34 : vector<1x128xf32>
    %42 = arith.mulf %10, %34 : vector<1x128xf32>
    %43 = arith.mulf %35, %39 : vector<1x128xf32>
    %44 = arith.mulf %36, %40 : vector<1x128xf32>
    %45 = arith.addf %43, %44 : vector<1x128xf32>
    %46 = arith.mulf %37, %41 : vector<1x128xf32>
    %47 = arith.addf %45, %46 : vector<1x128xf32>
    %48 = arith.mulf %38, %42 : vector<1x128xf32>
    %49 = arith.addf %47, %48 : vector<1x128xf32>
    %cst_14 = arith.constant 0.000000e+00 : f32
    %50 = vector.broadcast %cst_14 : f32 to vector<1x128xf32>
    %51 = arith.cmpf olt, %49, %50 : vector<1x128xf32>
    %cst_15 = arith.constant -1.000000e+00 : f32
    %cst_16 = arith.constant 1.000000e+00 : f32
    %52 = vector.broadcast %cst_15 : f32 to vector<1x128xf32>
    %53 = vector.broadcast %cst_16 : f32 to vector<1x128xf32>
    %54 = arith.select %51, %52, %53 : vector<1x128xi1>, vector<1x128xf32>
    %55 = arith.mulf %39, %54 : vector<1x128xf32>
    %56 = arith.mulf %40, %54 : vector<1x128xf32>
    %57 = arith.mulf %41, %54 : vector<1x128xf32>
    %58 = arith.mulf %42, %54 : vector<1x128xf32>
    %59 = math.absf %49 : vector<1x128xf32>
    %cst_17 = arith.constant 1.000000e+00 : f32
    %60 = vector.broadcast %cst_17 : f32 to vector<1x128xf32>
    %61 = arith.subf %60, %59 : vector<1x128xf32>
    %cst_18 = arith.constant 0.00999999977 : f32
    %62 = vector.broadcast %cst_18 : f32 to vector<1x128xf32>
    %63 = arith.cmpf olt, %61, %62 : vector<1x128xf32>
    %cst_19 = arith.constant 0.000000e+00 : f32
    %cst_20 = arith.constant 9.900000e-01 : f32
    %64 = vector.broadcast %cst_19 : f32 to vector<1x128xf32>
    %65 = arith.maximumf %64, %59 : vector<1x128xf32>
    %66 = vector.broadcast %cst_20 : f32 to vector<1x128xf32>
    %67 = arith.minimumf %66, %65 : vector<1x128xf32>
    %cst_21 = arith.constant -0.0012624911 : f32
    %68 = vector.broadcast %cst_21 : f32 to vector<1x128xf32>
    %69 = arith.mulf %68, %67 : vector<1x128xf32>
    %cst_22 = arith.constant 6.670090e-03 : f32
    %70 = vector.broadcast %cst_22 : f32 to vector<1x128xf32>
    %71 = arith.addf %69, %70 : vector<1x128xf32>
    %72 = arith.mulf %71, %67 : vector<1x128xf32>
    %cst_23 = arith.constant 0.0170881264 : f32
    %73 = vector.broadcast %cst_23 : f32 to vector<1x128xf32>
    %74 = arith.subf %72, %73 : vector<1x128xf32>
    %75 = arith.mulf %74, %67 : vector<1x128xf32>
    %cst_24 = arith.constant 0.0308918804 : f32
    %76 = vector.broadcast %cst_24 : f32 to vector<1x128xf32>
    %77 = arith.addf %75, %76 : vector<1x128xf32>
    %78 = arith.mulf %77, %67 : vector<1x128xf32>
    %cst_25 = arith.constant 0.0501743034 : f32
    %79 = vector.broadcast %cst_25 : f32 to vector<1x128xf32>
    %80 = arith.subf %78, %79 : vector<1x128xf32>
    %81 = arith.mulf %80, %67 : vector<1x128xf32>
    %cst_26 = arith.constant 0.0889789909 : f32
    %82 = vector.broadcast %cst_26 : f32 to vector<1x128xf32>
    %83 = arith.addf %81, %82 : vector<1x128xf32>
    %84 = arith.mulf %83, %67 : vector<1x128xf32>
    %cst_27 = arith.constant 0.214598805 : f32
    %85 = vector.broadcast %cst_27 : f32 to vector<1x128xf32>
    %86 = arith.subf %84, %85 : vector<1x128xf32>
    %87 = arith.mulf %86, %67 : vector<1x128xf32>
    %cst_28 = arith.constant 1.57079625 : f32
    %88 = vector.broadcast %cst_28 : f32 to vector<1x128xf32>
    %89 = arith.addf %87, %88 : vector<1x128xf32>
    %cst_29 = arith.constant 1.000000e+00 : f32
    %90 = vector.broadcast %cst_29 : f32 to vector<1x128xf32>
    %91 = arith.subf %90, %67 : vector<1x128xf32>
    %92 = math.sqrt %91 : vector<1x128xf32>
    %93 = arith.mulf %92, %89 : vector<1x128xf32>
    %94 = math.cos %93 : vector<1x128xf32>
    %95 = arith.subf %94, %67 : vector<1x128xf32>
    %96 = math.sin %93 : vector<1x128xf32>
    %cst_30 = arith.constant 9.99999997E-7 : f32
    %97 = vector.broadcast %cst_30 : f32 to vector<1x128xf32>
    %98 = arith.maximumf %96, %97 : vector<1x128xf32>
    %99 = arith.divf %95, %98 : vector<1x128xf32>
    %100 = arith.addf %93, %99 : vector<1x128xf32>
    %cst_31 = arith.constant 9.99999974E-5 : f32
    %101 = vector.broadcast %cst_31 : f32 to vector<1x128xf32>
    %102 = arith.select %63, %101, %100 : vector<1x128xi1>, vector<1x128xf32>
    %103 = math.sin %102 : vector<1x128xf32>
    %cst_32 = arith.constant 1.000000e-07 : f32
    %104 = vector.broadcast %cst_32 : f32 to vector<1x128xf32>
    %105 = arith.maximumf %103, %104 : vector<1x128xf32>
    %cst_33 = arith.constant 1.000000e+00 : f32
    %106 = vector.broadcast %cst_33 : f32 to vector<1x128xf32>
    %107 = arith.divf %106, %105 : vector<1x128xf32>
    %108 = vector.broadcast %2 : vector<8x1xf32> to vector<8x128xf32>
    %109 = vector.broadcast %102 : vector<1x128xf32> to vector<8x128xf32>
    %110 = arith.mulf %108, %109 : vector<8x128xf32>
    %111 = math.sin %110 : vector<8x128xf32>
    %112 = vector.broadcast %107 : vector<1x128xf32> to vector<8x128xf32>
    %113 = arith.mulf %111, %112 : vector<8x128xf32>
    %114 = vector.broadcast %0 : vector<8x1xf32> to vector<8x128xf32>
    %115 = vector.broadcast %102 : vector<1x128xf32> to vector<8x128xf32>
    %116 = arith.mulf %114, %115 : vector<8x128xf32>
    %117 = math.sin %116 : vector<8x128xf32>
    %118 = vector.broadcast %107 : vector<1x128xf32> to vector<8x128xf32>
    %119 = arith.mulf %117, %118 : vector<8x128xf32>
    %120 = vector.broadcast %35 : vector<1x128xf32> to vector<8x128xf32>
    %121 = arith.mulf %113, %120 : vector<8x128xf32>
    %122 = vector.broadcast %55 : vector<1x128xf32> to vector<8x128xf32>
    %123 = arith.mulf %119, %122 : vector<8x128xf32>
    %124 = arith.addf %121, %123 : vector<8x128xf32>
    %125 = vector.broadcast %36 : vector<1x128xf32> to vector<8x128xf32>
    %126 = arith.mulf %113, %125 : vector<8x128xf32>
    %127 = vector.broadcast %56 : vector<1x128xf32> to vector<8x128xf32>
    %128 = arith.mulf %119, %127 : vector<8x128xf32>
    %129 = arith.addf %126, %128 : vector<8x128xf32>
    %130 = vector.broadcast %37 : vector<1x128xf32> to vector<8x128xf32>
    %131 = arith.mulf %113, %130 : vector<8x128xf32>
    %132 = vector.broadcast %57 : vector<1x128xf32> to vector<8x128xf32>
    %133 = arith.mulf %119, %132 : vector<8x128xf32>
    %134 = arith.addf %131, %133 : vector<8x128xf32>
    %135 = vector.broadcast %38 : vector<1x128xf32> to vector<8x128xf32>
    %136 = arith.mulf %113, %135 : vector<8x128xf32>
    %137 = vector.broadcast %58 : vector<1x128xf32> to vector<8x128xf32>
    %138 = arith.mulf %119, %137 : vector<8x128xf32>
    %139 = arith.addf %136, %138 : vector<8x128xf32>
    %140 = arith.mulf %124, %124 : vector<8x128xf32>
    %141 = arith.mulf %129, %129 : vector<8x128xf32>
    %142 = arith.addf %140, %141 : vector<8x128xf32>
    %143 = arith.mulf %134, %134 : vector<8x128xf32>
    %144 = arith.addf %142, %143 : vector<8x128xf32>
    %145 = arith.mulf %139, %139 : vector<8x128xf32>
    %146 = arith.addf %144, %145 : vector<8x128xf32>
    %147 = tpu.reciprocal %146 {approx = true} : vector<8x128xf32> -> vector<8x128xf32>
    %148 = arith.mulf %146, %147 : vector<8x128xf32>
    %cst_34 = arith.constant 2.000000e+00 : f32
    %149 = vector.broadcast %cst_34 : f32 to vector<8x128xf32>
    %150 = arith.subf %149, %148 : vector<8x128xf32>
    %151 = arith.mulf %147, %150 : vector<8x128xf32>
    %152 = arith.addf %151, %151 : vector<8x128xf32>
    %153 = arith.mulf %129, %129 : vector<8x128xf32>
    %154 = arith.mulf %134, %134 : vector<8x128xf32>
    %155 = arith.mulf %139, %139 : vector<8x128xf32>
    %156 = arith.mulf %129, %134 : vector<8x128xf32>
    %157 = arith.mulf %129, %139 : vector<8x128xf32>
    %158 = arith.mulf %134, %139 : vector<8x128xf32>
    %159 = arith.mulf %139, %124 : vector<8x128xf32>
    %160 = arith.mulf %134, %124 : vector<8x128xf32>
    %161 = arith.mulf %129, %124 : vector<8x128xf32>
    %162 = arith.addf %154, %155 : vector<8x128xf32>
    %163 = arith.mulf %152, %162 : vector<8x128xf32>
    %cst_35 = arith.constant 1.000000e+00 : f32
    %164 = vector.broadcast %cst_35 : f32 to vector<8x128xf32>
    %165 = arith.subf %164, %163 : vector<8x128xf32>
    %c0_36 = arith.constant 0 : index
    %c0_37 = arith.constant 0 : index
    %c0_38 = arith.constant 0 : index
    %166 = vector.load %arg3[%c0_36, %c0_37, %c0_38] : memref<6x8x128xf32, #tpu.memory_space<vmem>>, vector<1x8x128xf32>
    %167 = vector.shape_cast %166 : vector<1x8x128xf32> to vector<8x128xf32>
    %168 = vector.shape_cast %165 : vector<8x128xf32> to vector<1x8x128xf32>
    tpu.vector_store %arg3[%c0_36, %c0_37, %c0_38], %168 {strides = array<i32>} : memref<6x8x128xf32, #tpu.memory_space<vmem>>, vector<1x8x128xf32>,
    %169 = arith.subf %156, %159 : vector<8x128xf32>
    %170 = arith.mulf %152, %169 : vector<8x128xf32>
    %c1_39 = arith.constant 1 : index
    %c0_40 = arith.constant 0 : index
    %c0_41 = arith.constant 0 : index
    %171 = vector.load %arg3[%c1_39, %c0_40, %c0_41] : memref<6x8x128xf32, #tpu.memory_space<vmem>>, vector<1x8x128xf32>
    %172 = vector.shape_cast %171 : vector<1x8x128xf32> to vector<8x128xf32>
    %173 = vector.shape_cast %170 : vector<8x128xf32> to vector<1x8x128xf32>
    tpu.vector_store %arg3[%c1_39, %c0_40, %c0_41], %173 {strides = array<i32>} : memref<6x8x128xf32, #tpu.memory_space<vmem>>, vector<1x8x128xf32>,
    %174 = arith.addf %157, %160 : vector<8x128xf32>
    %175 = arith.mulf %152, %174 : vector<8x128xf32>
    %c2_42 = arith.constant 2 : index
    %c0_43 = arith.constant 0 : index
    %c0_44 = arith.constant 0 : index
    %176 = vector.load %arg3[%c2_42, %c0_43, %c0_44] : memref<6x8x128xf32, #tpu.memory_space<vmem>>, vector<1x8x128xf32>
    %177 = vector.shape_cast %176 : vector<1x8x128xf32> to vector<8x128xf32>
    %178 = vector.shape_cast %175 : vector<8x128xf32> to vector<1x8x128xf32>
    tpu.vector_store %arg3[%c2_42, %c0_43, %c0_44], %178 {strides = array<i32>} : memref<6x8x128xf32, #tpu.memory_space<vmem>>, vector<1x8x128xf32>,
    %179 = arith.addf %156, %159 : vector<8x128xf32>
    %180 = arith.mulf %152, %179 : vector<8x128xf32>
    %c3_45 = arith.constant 3 : index
    %c0_46 = arith.constant 0 : index
    %c0_47 = arith.constant 0 : index
    %181 = vector.load %arg3[%c3_45, %c0_46, %c0_47] : memref<6x8x128xf32, #tpu.memory_space<vmem>>, vector<1x8x128xf32>
    %182 = vector.shape_cast %181 : vector<1x8x128xf32> to vector<8x128xf32>
    %183 = vector.shape_cast %180 : vector<8x128xf32> to vector<1x8x128xf32>
    tpu.vector_store %arg3[%c3_45, %c0_46, %c0_47], %183 {strides = array<i32>} : memref<6x8x128xf32, #tpu.memory_space<vmem>>, vector<1x8x128xf32>,
    %184 = arith.addf %153, %155 : vector<8x128xf32>
    %185 = arith.mulf %152, %184 : vector<8x128xf32>
    %cst_48 = arith.constant 1.000000e+00 : f32
    %186 = vector.broadcast %cst_48 : f32 to vector<8x128xf32>
    %187 = arith.subf %186, %185 : vector<8x128xf32>
    %c4_49 = arith.constant 4 : index
    %c0_50 = arith.constant 0 : index
    %c0_51 = arith.constant 0 : index
    %188 = vector.load %arg3[%c4_49, %c0_50, %c0_51] : memref<6x8x128xf32, #tpu.memory_space<vmem>>, vector<1x8x128xf32>
    %189 = vector.shape_cast %188 : vector<1x8x128xf32> to vector<8x128xf32>
    %190 = vector.shape_cast %187 : vector<8x128xf32> to vector<1x8x128xf32>
    tpu.vector_store %arg3[%c4_49, %c0_50, %c0_51], %190 {strides = array<i32>} : memref<6x8x128xf32, #tpu.memory_space<vmem>>, vector<1x8x128xf32>,
    %191 = arith.subf %158, %161 : vector<8x128xf32>
    %192 = arith.mulf %152, %191 : vector<8x128xf32>
    %c5_52 = arith.constant 5 : index
    %c0_53 = arith.constant 0 : index
    %c0_54 = arith.constant 0 : index
    %193 = vector.load %arg3[%c5_52, %c0_53, %c0_54] : memref<6x8x128xf32, #tpu.memory_space<vmem>>, vector<1x8x128xf32>
    %194 = vector.shape_cast %193 : vector<1x8x128xf32> to vector<8x128xf32>
    %195 = vector.shape_cast %192 : vector<8x128xf32> to vector<1x8x128xf32>
    tpu.vector_store %arg3[%c5_52, %c0_53, %c0_54], %195 {strides = array<i32>} : memref<6x8x128xf32, #tpu.memory_space<vmem>>, vector<1x8x128xf32>,
    %c8 = arith.constant 8 : index
    %c0_55 = arith.constant 0 : index
    %196 = vector.load %arg2[%c8, %c0_55] : memref<16x128xf32, #tpu.memory_space<vmem>>, vector<1x128xf32>
    %c11 = arith.constant 11 : index
    %c0_56 = arith.constant 0 : index
    %197 = vector.load %arg2[%c11, %c0_56] : memref<16x128xf32, #tpu.memory_space<vmem>>, vector<1x128xf32>
    %198 = arith.subf %197, %196 : vector<1x128xf32>
    %199 = vector.broadcast %0 : vector<8x1xf32> to vector<8x128xf32>
    %200 = vector.broadcast %198 : vector<1x128xf32> to vector<8x128xf32>
    %201 = arith.mulf %199, %200 : vector<8x128xf32>
    %202 = vector.broadcast %196 : vector<1x128xf32> to vector<8x128xf32>
    %203 = arith.addf %202, %201 : vector<8x128xf32>
    %c0_57 = arith.constant 0 : index
    %c0_58 = arith.constant 0 : index
    %c0_59 = arith.constant 0 : index
    %204 = vector.load %arg4[%c0_57, %c0_58, %c0_59] : memref<3x8x128xf32, #tpu.memory_space<vmem>>, vector<1x8x128xf32>
    %205 = vector.shape_cast %204 : vector<1x8x128xf32> to vector<8x128xf32>
    %206 = vector.shape_cast %203 : vector<8x128xf32> to vector<1x8x128xf32>
    tpu.vector_store %arg4[%c0_57, %c0_58, %c0_59], %206 {strides = array<i32>} : memref<3x8x128xf32, #tpu.memory_space<vmem>>, vector<1x8x128xf32>,
    %c9 = arith.constant 9 : index
    %c0_60 = arith.constant 0 : index
    %207 = vector.load %arg2[%c9, %c0_60] : memref<16x128xf32, #tpu.memory_space<vmem>>, vector<1x128xf32>
    %c12 = arith.constant 12 : index
    %c0_61 = arith.constant 0 : index
    %208 = vector.load %arg2[%c12, %c0_61] : memref<16x128xf32, #tpu.memory_space<vmem>>, vector<1x128xf32>
    %209 = arith.subf %208, %207 : vector<1x128xf32>
    %210 = vector.broadcast %0 : vector<8x1xf32> to vector<8x128xf32>
    %211 = vector.broadcast %209 : vector<1x128xf32> to vector<8x128xf32>
    %212 = arith.mulf %210, %211 : vector<8x128xf32>
    %213 = vector.broadcast %207 : vector<1x128xf32> to vector<8x128xf32>
    %214 = arith.addf %213, %212 : vector<8x128xf32>
    %c1_62 = arith.constant 1 : index
    %c0_63 = arith.constant 0 : index
    %c0_64 = arith.constant 0 : index
    %215 = vector.load %arg4[%c1_62, %c0_63, %c0_64] : memref<3x8x128xf32, #tpu.memory_space<vmem>>, vector<1x8x128xf32>
    %216 = vector.shape_cast %215 : vector<1x8x128xf32> to vector<8x128xf32>
    %217 = vector.shape_cast %214 : vector<8x128xf32> to vector<1x8x128xf32>
    tpu.vector_store %arg4[%c1_62, %c0_63, %c0_64], %217 {strides = array<i32>} : memref<3x8x128xf32, #tpu.memory_space<vmem>>, vector<1x8x128xf32>,
    %c10 = arith.constant 10 : index
    %c0_65 = arith.constant 0 : index
    %218 = vector.load %arg2[%c10, %c0_65] : memref<16x128xf32, #tpu.memory_space<vmem>>, vector<1x128xf32>
    %c13 = arith.constant 13 : index
    %c0_66 = arith.constant 0 : index
    %219 = vector.load %arg2[%c13, %c0_66] : memref<16x128xf32, #tpu.memory_space<vmem>>, vector<1x128xf32>
    %220 = arith.subf %219, %218 : vector<1x128xf32>
    %221 = vector.broadcast %0 : vector<8x1xf32> to vector<8x128xf32>
    %222 = vector.broadcast %220 : vector<1x128xf32> to vector<8x128xf32>
    %223 = arith.mulf %221, %222 : vector<8x128xf32>
    %224 = vector.broadcast %218 : vector<1x128xf32> to vector<8x128xf32>
    %225 = arith.addf %224, %223 : vector<8x128xf32>
    %c2_67 = arith.constant 2 : index
    %c0_68 = arith.constant 0 : index
    %c0_69 = arith.constant 0 : index
    %226 = vector.load %arg4[%c2_67, %c0_68, %c0_69] : memref<3x8x128xf32, #tpu.memory_space<vmem>>, vector<1x8x128xf32>
    %227 = vector.shape_cast %226 : vector<1x8x128xf32> to vector<8x128xf32>
    %228 = vector.shape_cast %225 : vector<8x128xf32> to vector<1x8x128xf32>
    tpu.vector_store %arg4[%c2_67, %c0_68, %c0_69], %228 {strides = array<i32>} : memref<3x8x128xf32, #tpu.memory_space<vmem>>, vector<1x8x128xf32>,
    return
  }
  func.func @transform_0(%arg0: i32) -> (i32, i32) {
    %c0_i32 = arith.constant 0 : i32
    %c0_i32_0 = arith.constant 0 : i32
    %c0_i32_1 = arith.constant 0 : i32
    return %c0_i32, %c0_i32_0 : i32, i32
  }
  func.func @transform_1(%arg0: i32) -> (i32, i32) {
    %c0_i32 = arith.constant 0 : i32
    %c0_i32_0 = arith.constant 0 : i32
    return %c0_i32, %arg0 : i32, i32
  }
  func.func @transform_2(%arg0: i32) -> (i32, i32, i32) {
    %c0_i32 = arith.constant 0 : i32
    %c0_i32_0 = arith.constant 0 : i32
    %c0_i32_1 = arith.constant 0 : i32
    return %c0_i32, %c0_i32_0, %arg0 : i32, i32, i32
  }
  func.func @transform_3(%arg0: i32) -> (i32, i32, i32) {
    %c0_i32 = arith.constant 0 : i32
    %c0_i32_0 = arith.constant 0 : i32
    %c0_i32_1 = arith.constant 0 : i32
    return %c0_i32, %c0_i32_0, %arg0 : i32, i32, i32
  }
}

</mosaic_0001>

<bundles_post_ra>
// kernel: tpu_custom_call.1
= control target key start
LH: loop header
LB: loop body
LE: loop exit
PB: predicated region body
PF: predicated region fallthrough
CT: control target
= control target key end

     0   :  { %9 = vsyncpa [#allocation3], 0  ;;  %s1338_s0 = inlined_call_operand.vmem [shape: f32[8,1], index: 0, kind: input, shape index: {}]   ;;  %s1339_s1 = inlined_call_operand.hbm [shape: f32[16,128], index: 1, kind: input, shape index: {}]   ;;  %s1340_s2 = inlined_call_operand.hbm [shape: f32[6,8,128], index: 2, kind: output, shape index: {0}]   ;;  %s1341_s3 = inlined_call_operand.hbm [shape: f32[3,8,128], index: 3, kind: output, shape index: {1}]  }
   0x1   :  { %10 = vsyncpa [#allocation4], 0 }
   0x2   :  { %11 = vsyncpa [#allocation7], 0  ;;  %s987_s12 = smov [#allocation2]  }
   0x3   :  { %s19_s13 = sshll.u32 %s987_s12, 4  ;;  %s20_s13 = int_to_ptr.vmem [resolvable:$true] %s19_s13 }
   0x4   :  { %s929_s14 = scalar_lea.vmem %s20_s13, 256  ;;  %p934_p1 = scmp.lt.s32.totalorder %s20_s13, %s20_s13 }
   0x5   :  { %p930_p0 = scmp.ne.s32.totalorder %s20_s13, %s929_s14  ;;  %p935_p2 = scmp.lt.s32.totalorder %s929_s14, %s929_s14 }
   0x7   :  { %p936_p3 = por %p935_p2, %p934_p1 }
   0x9   :  { %p937_p4 = pnand %p936_p3, %p930_p0 }
   0xb   :  { %940 = shalt.err (!%p937_p4)
}
   0xc   :  { %s988_s15 = smov 128   ;;  %s989_s16 = smov 8  }
   0xd   :  { %25 = dma.hbm_to_vmem [thread:$0]  %s1339_s1, 256, %s20_s13, [#allocation3], %s988_s15, %s988_s15, %s989_s16  }
   0xe   :  { %981 = dma.done.wait [#allocation3], 256  }
   0xf   :  { %982 = vsyncadd [#allocation3], 4294967040  ;;  %v990_v0 = vmov 0   ;;  %v29_v1 = vld [vmem:[%s1338_s0] sm:$0xff]  ;;  %v991_v55 = vmov 1.0   ;;  %s998_s0 = smov [#allocation6]  }
  0x10   :  { %888 = vset.pattern.permute.xlu0 %v990_v0  ;;  %v31_v2 = vld [vmem:[#allocation2] sm:$0x1]  ;;  %v32_v3 = vld [vmem:[#allocation2 + $0x1] sm:$0x1]  ;;  %v30_v4 = vsub.f32 1.0, %v29_v1  ;;  %s820_s1 = sshll.u32 %s998_s0, 4  ;;  %s821_s1 = int_to_ptr.vmem [resolvable:$true] %s820_s1 }
  0x11   :  { %v33_v5 = vld [vmem:[#allocation2 + $0x2] sm:$0x1]  ;;  %v34_v6 = vld [vmem:[#allocation2 + $0x3] sm:$0x1]  ;;  %v39_v7 = vmul.f32 %v31_v2, %v31_v2  ;;  %v40_v8 = vmul.f32 %v32_v3, %v32_v3  ;;  %v35_v9 = vld [vmem:[#allocation2 + $0x4] sm:$0x1]  ;;  %p946_p6 = scmp.lt.s32.totalorder %s821_s1, %s821_s1 }
  0x12   :  { %v36_v10 = vld [vmem:[#allocation2 + $0x5] sm:$0x1]  ;;  %v37_v11 = vld [vmem:[#allocation2 + $0x6] sm:$0x1]  ;;  %v42_v12 = vmul.f32 %v33_v5, %v33_v5  ;;  %v44_v13 = vmul.f32 %v34_v6, %v34_v6  ;;  %444 = vperm.xlu0 %888, %v30_v4   ;;  %v38_v14 = vld [vmem:[#allocation2 + $0x7] sm:$0x1]  ;;  %v56_v16 = vmul.f32 %v35_v9, %v35_v9 }
  0x13   :  { %v41_v15 = vadd.f32 %v40_v8, %v39_v7  ;;  %v57_v17 = vmul.f32 %v36_v10, %v36_v10  ;;  %v59_v18 = vmul.f32 %v37_v11, %v37_v11  ;;  %v61_v21 = vmul.f32 %v38_v14, %v38_v14  ;;  %s941_s21 = scalar_lea.vmem %s821_s1, 384 }
  0x14   :  { %p942_p5 = scmp.ne.s32.totalorder %s821_s1, %s941_s21  ;;  %p947_p7 = scmp.lt.s32.totalorder %s941_s21, %s941_s21 }
  0x15   :  { %v43_v19 = vadd.f32 %v42_v12, %v41_v15  ;;  %v58_v20 = vadd.f32 %v57_v17, %v56_v16 }
  0x16   :  { %563 = vperm.xlu0 %888, %v29_v1   ;;  %p948_p8 = por %p947_p7, %p946_p6 }
  0x17   :  { %v45_v22 = vadd.f32 %v44_v13, %v43_v19  ;;  %v60_v23 = vadd.f32 %v59_v18, %v58_v20 }
  0x18   :  { %p949_p9 = pnand %p948_p8, %p942_p5 }
  0x19   :  { %889 = vrsqrt.f32 %v45_v22  ;;  %v62_v24 = vadd.f32 %v61_v21, %v60_v23  ;;  %vm48_vm0 = vcmp.eq.f32.partialorder %v45_v22, inf  ;;  %v51_v26 = vand.u32 2147483648, %v45_v22 }
  0x1a   :  { %vm50_vm1 = vcmp.eq.f32.partialorder %v45_v22, 0.0 }
  0x1b   :  { %891 = vrsqrt.f32 %v62_v24  ;;  %vm65_vm2 = vcmp.eq.f32.partialorder %v62_v24, inf  ;;  %v68_v30 = vand.u32 2147483648, %v62_v24  ;;  %vm67_vm3 = vcmp.eq.f32.partialorder %v62_v24, 0.0 }
  0x26   :  { %v890_v25 = vpop.eup %889 }
  0x27   :  { %v47_v27 = vmul.f32 %v890_v25, %v45_v22 }
  0x28   :  { %v892_v28 = vpop.eup %891 }
  0x29   :  { %v49_v29 = vsel %vm48_vm0, %v45_v22, %v47_v27  ;;  %v64_v32 = vmul.f32 %v892_v28, %v62_v24 }
  0x2a   :  { %v52_v31 = vsel %vm50_vm1, %v51_v26, %v49_v29 }
  0x2b   :  { %v53_v33 = vadd.f32 1e-08, %v52_v31  ;;  %v66_v34 = vsel %vm65_vm2, %v62_v24, %v64_v32  ;;  %v992_v31 = vmov 683565275  }
  0x2c   :  { %v69_v35 = vsel %vm67_vm3, %v68_v30, %v66_v34 }
  0x2d   :  { %893 = vrcp.f32 %v53_v33  ;;  %v70_v36 = vadd.f32 1e-08, %v69_v35  ;;  %v993_v33 = vmov 2475754826   ;;  %v994_v35 = vmov 2131351028  }
  0x2f   :  { %895 = vrcp.f32 %v70_v36 }
  0x3a   :  { %v894_v37 = vpop.eup %893 }
  0x3b   :  { %v1029_v38 = vmul.f32 %v894_v37, %v31_v2  ;;  %v1031_v39 = vmul.f32 %v894_v37, %v32_v3  ;;  %v1033_v40 = vmul.f32 %v894_v37, %v33_v5  ;;  %v1035_v42 = vmul.f32 %v894_v37, %v34_v6 }
  0x3c   :  { %v896_v41 = vpop.eup %895  ;;  %v995_v37 = vmov 2102212464  }
  0x3d   :  { %v77_v43 = vmul.f32 %v896_v41, %v35_v9  ;;  %v78_v44 = vmul.f32 %v896_v41, %v36_v10  ;;  %v79_v45 = vmul.f32 %v896_v41, %v37_v11  ;;  %v80_v46 = vmul.f32 %v896_v41, %v38_v14 }
  0x3f   :  { %v81_v47 = vmul.f32 %v77_v43, %v1029_v38  ;;  %v82_v48 = vmul.f32 %v78_v44, %v1031_v39  ;;  %v84_v49 = vmul.f32 %v79_v45, %v1033_v40  ;;  %v86_v51 = vmul.f32 %v80_v46, %v1035_v42 }
  0x41   :  { %v83_v50 = vadd.f32 %v82_v48, %v81_v47 }
  0x43   :  { %v85_v52 = vadd.f32 %v84_v49, %v83_v50  ;;  %v997_v50 = vmov 1326507024  }
  0x45   :  { %v1041_v53 = vadd.f32 %v86_v51, %v85_v52 }
  0x47   :  { %vm88_vm4 = vcmp.lt.f32.partialorder %v1041_v53, 0.0  ;;  %v94_v54 = vand.u32 2147483647, %v1041_v53 }
  0x48   :  { %v89_v56 = vsel %vm88_vm4, -1.0, %v991_v55 }
  0x49   :  { %v1045_v57 = vmul.f32 %v89_v56, %v77_v43  ;;  %v1047_v58 = vmul.f32 %v89_v56, %v78_v44  ;;  %v1049_v59 = vmul.f32 %v89_v56, %v79_v45  ;;  %v1051_v60 = vmul.f32 %v89_v56, %v80_v46 }
  0x4a   :  { %v97_v61 = vmax.f32 %v94_v54, 0.0  ;;  %v996_v43 = vmov 920167782  }
  0x4c   :  { %v1055_v62 = vmin.f32 %v97_v61, 0.99 }
  0x4e   :  { %v99_v63 = vmul.f32 -0.0012624911, %v1055_v62  ;;  %v113_v0 = vsub.f32 1.0, %v1055_v62 }
  0x50   :  { %v100_v1 = vadd.f32 0.00667009, %v99_v63  ;;  %897 = vrsqrt.f32 %v113_v0  ;;  %vm116_vm5 = vcmp.eq.f32.partialorder %v113_v0, inf  ;;  %v119_v13 = vand.u32 2147483648, %v113_v0 }
  0x51   :  { %vm118_vm6 = vcmp.eq.f32.partialorder %v113_v0, 0.0 }
  0x52   :  { %v101_v2 = vmul.f32 %v100_v1, %v1055_v62 }
  0x54   :  { %v836_v3 = vadd.f32 -0.017088126, %v101_v2 }
  0x56   :  { %v103_v4 = vmul.f32 %v836_v3, %v1055_v62 }
  0x58   :  { %v104_v5 = vadd.f32 0.03089188, %v103_v4 }
  0x5a   :  { %v105_v6 = vmul.f32 %v104_v5, %v1055_v62 }
  0x5c   :  { %v837_v7 = vadd.f32 -0.050174303, %v105_v6 }
  0x5d   :  { %v898_v8 = vpop.eup %897 }
  0x5e   :  { %v107_v9 = vmul.f32 %v837_v7, %v1055_v62  ;;  %v115_v11 = vmul.f32 %v898_v8, %v113_v0 }
  0x60   :  { %v108_v10 = vadd.f32 0.08897899, %v107_v9  ;;  %v117_v15 = vsel %vm116_vm5, %v113_v0, %v115_v11 }
  0x61   :  { %v120_v17 = vsel %vm118_vm6, %v119_v13, %v117_v15 }
  0x62   :  { %v109_v12 = vmul.f32 %v108_v10, %v1055_v62 }
  0x64   :  { %v838_v14 = vadd.f32 -0.2145988, %v109_v12 }
  0x66   :  { %v111_v16 = vmul.f32 %v838_v14, %v1055_v62 }
  0x68   :  { %v112_v18 = vadd.f32 1.5707963, %v111_v16 }
  0x6a   :  { %v1065_v19 = vmul.f32 %v120_v17, %v112_v18  ;;  %v447_v17 = vlaneseq }
  0x6c   :  { %v125_v20 = vand.u32 2139095040, %v1065_v19  ;;  %v122_v22 = vand.u32 2147483647, %v1065_v19  ;;  %vm124_vm14 = vcmp.lt.s32.totalorder %v1065_v19, 0  ;;  %vm214_vm3 = vweird.f32 %v1065_v19 }
  0x6e   :  { %v126_v21 = vshrl.u32 %v125_v20, 23  ;;  %v129_v25 = vand.u32 8388607, %v122_v22  ;;  %v759_v20 = vld [vmem:[#allocation2 + $0x8] sm:$0x1] }
  0x6f   :  { %vm123_vm15 = vcmp.le.f32.partialorder %v122_v22, 0.7853982 }
  0x70   :  { %v839_v23 = vadd.s32 4294967169, %v126_v21  ;;  %v130_v28 = vor.u32 8388608, %v129_v25  ;;  %v774_v25 = vld [vmem:[#allocation2 + $0xc] sm:$0x1] }
  0x72   :  { %v132_v24 = vadd.s32 1, %v839_v23  ;;  %v170_v52 = vshll.u32 %v130_v28, 8  ;;  %v760_v23 = vld [vmem:[#allocation2 + $0xb] sm:$0x1] }
  0x74   :  { %vm133_vm7 = vcmp.gt.s32.totalorder %v132_v24, 0 }
  0x75   :  { %v134_v26 = vsel %vm133_vm7, %v132_v24, 0  ;;  %v773_v24 = vld [vmem:[#allocation2 + $0x9] sm:$0x1] }
  0x76   :  { %v136_v27 = vand.u32 31, %v134_v26  ;;  %v135_v29 = vshrl.u32 %v134_v26, 5  ;;  %v788_v26 = vld [vmem:[#allocation2 + $0xa] sm:$0x1] }
  0x78   :  { %v137_v30 = vsub.s32 32, %v136_v27  ;;  %v139_v32 = vshll.u32 %v992_v31, %v136_v27  ;;  %v142_v34 = vshll.u32 %v993_v33, %v136_v27  ;;  %v145_v36 = vshll.u32 %v994_v35, %v136_v27 }
  0x79   :  { %v148_v41 = vshll.u32 %v995_v37, %v136_v27  ;;  %v151_v44 = vshll.u32 %v996_v43, %v136_v27  ;;  %vm154_vm8 = vcmp.lt.s32.totalorder %v135_v29, 1  ;;  %vm157_vm9 = vcmp.lt.s32.totalorder %v135_v29, 4  ;;  %v789_v27 = vld [vmem:[#allocation2 + $0xd] sm:$0x1] }
  0x7a   :  { %v138_v45 = vshrl.u32 %v992_v31, %v137_v30  ;;  %v140_v46 = vshrl.u32 %v993_v33, %v137_v30  ;;  %v143_v47 = vshrl.u32 %v994_v35, %v137_v30  ;;  %v146_v48 = vshrl.u32 %v995_v37, %v137_v30 }
  0x7b   :  { %v149_v49 = vshrl.u32 %v996_v43, %v137_v30  ;;  %v152_v51 = vshrl.u32 %v997_v50, %v137_v30  ;;  %vm155_vm10 = vcmp.lt.s32.totalorder %v135_v29, 2  ;;  %vm156_vm11 = vcmp.lt.s32.totalorder %v135_v29, 3 }
  0x7c   :  { %v141_v55 = vor.u32 %v140_v46, %v139_v32  ;;  %v144_v56 = vor.u32 %v143_v47, %v142_v34  ;;  %v147_v61 = vor.u32 %v146_v48, %v145_v36  ;;  %v448_v29 = vshrl.u32 %v447_v17, 7 }
  0x7d   :  { %v150_v63 = vor.u32 %v149_v49, %v148_v41  ;;  %v153_v0 = vor.u32 %v152_v51, %v151_v44  ;;  %v761_v32 = vsub.f32 %v760_v23, %v759_v20  ;;  %v775_v34 = vsub.f32 %v774_v25, %v773_v24 }
  0x7e   :  { %v158_v1 = vsel %vm154_vm8, %v138_v45, %v141_v55  ;;  %v159_v2 = vsel %vm157_vm9, %v147_v61, 2102212464  ;;  %v162_v3 = vsel %vm154_vm8, %v141_v55, %v144_v56  ;;  %v166_v4 = vsel %vm154_vm8, %v144_v56, %v147_v61 }
  0x7f   :  { %v160_v5 = vsel %vm156_vm11, %v144_v56, %v159_v2  ;;  %v163_v6 = vsel %vm157_vm9, %v150_v63, 920167782  ;;  %v167_v7 = vsel %vm157_vm9, %v153_v0, 1326507024  ;;  %v790_v36 = vsub.f32 %v789_v27, %v788_v26 }
  0x80   :  { %v164_v8 = vsel %vm156_vm11, %v147_v61, %v163_v6  ;;  %v168_v9 = vsel %vm156_vm11, %v150_v63, %v167_v7  ;;  %v161_v10 = vsel %vm155_vm10, %v158_v1, %v160_v5  ;;  %v1091_v44 = vsub.s32 0, %v448_v29 }
  0x81   :  { %v165_v11 = vsel %vm155_vm10, %v162_v3, %v164_v8  ;;  %v169_v12 = vsel %vm155_vm10, %v166_v4, %v168_v9  ;;  %v177_v18 = vmul.u32 %v170_v52, %v161_v10 }
  0x82   :  { %v1082_v13 = vmul.u32.u64.low %v170_v52, %v169_v12  ;;  %v1083_v14 = vmul.u32.u64.high %v170_v52, %v169_v12, %v1082_v13  ;;  %v1085_v15 = vmul.u32.u64.low %v170_v52, %v165_v11  ;;  %v1086_v16 = vmul.u32.u64.high %v170_v52, %v165_v11, %v1085_v15 }
  0x83   :  { %v765_v47 = vrot.slane %v761_v32, %v1091_v44  ;;  %v779_v48 = vrot.slane %v775_v34, %v1091_v44  ;;  %v794_v49 = vrot.slane %v790_v36, %v1091_v44  ;;  %v770_v52 = vrot.slane %v759_v20, %v1091_v44 }
  0x84   :  { %vm179_vm12 = vc.u32 %v1083_v14, %v1085_v15  ;;  %v180_v21 = vadd.s32 1, %v1086_v16  ;;  %v784_v55 = vrot.slane %v773_v24, %v1091_v44  ;;  %v799_v56 = vrot.slane %v788_v26, %v1091_v44 }
  0x85   :  { %v178_v10 = vadd.s32 %v1085_v15, %v1083_v14 }
  0x86   :  { %v181_v28 = vsel %vm179_vm12, %v180_v21, %v1086_v16 }
  0x87   :  { %v182_v30 = vadd.s32 %v181_v28, %v177_v18 }
  0x89   :  { %v183_v41 = vadd.s32 536870912, %v182_v30 }
  0x8b   :  { %v184_v46 = vshrl.u32 %v183_v41, 30 }
  0x8d   :  { %v1093_v45 = vpop.permute.xlu0 %444  ;;  %v185_v51 = vshll.u32 %v184_v46, 30  ;;  %v208_v27 = vsub.s32 4, %v184_v46 }
  0x8f   :  { %v186_v63 = vsub.s32 %v182_v30, %v185_v51  ;;  %v209_v28 = vsel %vm124_vm14, %v208_v27, %v184_v46 }
  0x90   :  { %v211_v30 = vsel %vm123_vm15, 0, %v209_v28 }
  0x91   :  { %v1101_v61 = vpop.permute.xlu0 %563  ;;  %v188_v3 = vsub.s32 0, %v186_v63  ;;  %v319_v32 = vadd.s32 3, %v211_v30  ;;  %v215_v22 = vand.u32 3, %v211_v30 }
  0x92   :  { %v766_v0 = vmul.f32 %v765_v47, %v1101_v61  ;;  %v780_v1 = vmul.f32 %v779_v48, %v1101_v61  ;;  %v795_v2 = vmul.f32 %v794_v49, %v1101_v61 }
  0x93   :  { %v840_v7 = vmin.u32 %v188_v3, %v186_v63  ;;  %v320_v34 = vand.u32 3, %v319_v32  ;;  %vm217_vm4 = vcmp.eq.s32.totalorder %v215_v22, 0  ;;  %vm220_vm5 = vcmp.eq.s32.totalorder %v215_v22, 2 }
  0x94   :  { %v771_v4 = vadd.f32 %v770_v52, %v766_v0  ;;  %v785_v5 = vadd.f32 %v784_v55, %v780_v1  ;;  %v800_v6 = vadd.f32 %v799_v56, %v795_v2  ;;  %vm216_vm6 = vcmp.lt.s32.totalorder %v215_v22, 2 }
  0x95   :  { %v190_v8 = vclz %v840_v7  ;;  %vm325_vm0 = vcmp.eq.s32.totalorder %v320_v34, 2  ;;  %vm322_vm1 = vcmp.eq.s32.totalorder %v320_v34, 0  ;;  %vm321_vm2 = vcmp.lt.s32.totalorder %v320_v34, 2 }
  0x96   :  { %772 = vst [vmem:[#allocation6] sm:$0xff] %v771_v4  ;;  %787 = vst [vmem:[#allocation6 + $0x8] sm:$0xff] %v785_v5  ;;  %v95_v3 = vsub.f32 1.0, %v94_v54 }
  0x97   :  { %802 = vst [vmem:[#allocation6 + $0x10] sm:$0xff] %v800_v6  ;;  %v841_v9 = vadd.s32 4294967294, %v190_v8 }
  0x98   :  { %vm96_vm7 = vcmp.lt.f32.partialorder %v95_v3, 0.01 }
  0x99   :  { %vm842_vm13 = vcmp.lt.s32.totalorder %v841_v9, 0 }
  0x9a   :  { %v193_v11 = vsel %vm842_vm13, 0, %v841_v9 }
  0x9b   :  { %v194_v12 = vsub.s32 32, %v193_v11  ;;  %v195_v13 = vshll.u32 %v186_v63, %v193_v11  ;;  %v198_v16 = vsub.s32 4294967266, %v193_v11 }
  0x9d   :  { %v196_v17 = vshrl.u32 %v178_v10, %v194_v12  ;;  %v199_v18 = vadd.s32 127, %v198_v16 }
  0x9f   :  { %v197_v20 = vor.u32 %v196_v17, %v195_v13  ;;  %v200_v21 = vshll.u32 %v199_v18, 23 }
  0xa1   :  { %v201_v23 = vor.u32 4788187, %v200_v21  ;;  %v204_v24 = vcvt.s32.f32 %v197_v20 }
  0xa3   :  { %v202_v25 = vand.u32 2147483647, %v201_v23 }
  0xa5   :  { %v205_v26 = vmul.f32 %v204_v24, %v202_v25 }
  0xa7   :  { %v206_v14 = vxor.u32 2147483648, %v205_v26 }
  0xa9   :  { %v207_v15 = vsel %vm124_vm14, %v206_v14, %v205_v26 }
  0xaa   :  { %v210_v29 = vsel %vm123_vm15, %v1065_v19, %v207_v15 }
  0xab   :  { %899 = vcosq.f32 %v210_v29 }
  0xac   :  { %901 = vsinq.f32 %v210_v29 }
  0xb8   :  { %v900_v36 = vpop.eup %899 }
  0xb9   :  { %v902_v41 = vpop.eup %901  ;;  %v221_v47 = vxor.u32 2147483648, %v900_v36 }
  0xba   :  { %v218_v48 = vxor.u32 2147483648, %v902_v41 }
  0xbb   :  { %v327_v49 = vsel %vm325_vm0, %v221_v47, %v902_v41  ;;  %v222_v63 = vsel %vm220_vm5, %v221_v47, %v902_v41 }
  0xbc   :  { %v324_v51 = vsel %vm322_vm1, %v900_v36, %v218_v48  ;;  %v219_v56 = vsel %vm217_vm4, %v900_v36, %v218_v48 }
  0xbd   :  { %v328_v46 = vsel %vm321_vm2, %v324_v51, %v327_v49  ;;  %v223_v0 = vsel %vm216_vm6, %v219_v56, %v222_v63 }
  0xbe   :  { %v329_v52 = vsel %vm214_vm3, nan, %v328_v46  ;;  %v224_v1 = vsel %vm214_vm3, nan, %v223_v0 }
  0xbf   :  { %v330_v55 = vmax.f32 %v329_v52, 1e-06  ;;  %v225_v2 = vsub.f32 %v224_v1, %v1055_v62 }
  0xc1   :  { %903 = vrcp.f32 %v330_v55 }
  0xce   :  { %v904_v4 = vpop.eup %903 }
  0xcf   :  { %v332_v5 = vmul.f32 %v904_v4, %v225_v2 }
  0xd1   :  { %v333_v6 = vadd.f32 %v332_v5, %v1065_v19 }
  0xd3   :  { %v1116_v7 = vsel %vm96_vm7, 0.0001, %v333_v6 }
  0xd4   :  { %v335_v8 = vand.u32 2147483647, %v1116_v7  ;;  %v338_v9 = vand.u32 2139095040, %v1116_v7  ;;  %v450_v10 = vrot.slane %v1116_v7, %v1091_v44 }
  0xd6   :  { %v339_v11 = vshrl.u32 %v338_v9, 23  ;;  %v342_v62 = vand.u32 8388607, %v335_v8  ;;  %v1125_v53 = vmul.f32 %v450_v10, %v1093_v45  ;;  %v1128_v54 = vmul.f32 %v1101_v61, %v450_v10 }
  0xd8   :  { %v847_v19 = vadd.s32 4294967169, %v339_v11  ;;  %v455_v12 = vand.u32 2139095040, %v1125_v53  ;;  %v343_v16 = vor.u32 8388608, %v342_v62  ;;  %v452_v17 = vand.u32 2147483647, %v1125_v53 }
  0xd9   :  { %v570_v20 = vand.u32 2139095040, %v1128_v54 }
  0xda   :  { %v345_v13 = vadd.s32 1, %v847_v19  ;;  %v456_v18 = vshrl.u32 %v455_v12, 23  ;;  %v1133_v26 = vshll.u32 %v343_v16, 8  ;;  %v1137_v61 = vand.u32 8388607, %v452_v17 }
  0xdb   :  { %v571_v24 = vshrl.u32 %v570_v20, 23 }
  0xdc   :  { %vm346_vm8 = vcmp.gt.s32.totalorder %v345_v13, 0  ;;  %v851_v23 = vadd.s32 4294967169, %v456_v18  ;;  %v460_v9 = vor.u32 8388608, %v1137_v61 }
  0xdd   :  { %v347_v21 = vsel %vm346_vm8, %v345_v13, 0  ;;  %v855_v34 = vadd.s32 4294967169, %v571_v24 }
  0xde   :  { %v348_v25 = vshrl.u32 %v347_v21, 5  ;;  %v349_v45 = vand.u32 31, %v347_v21  ;;  %v462_v27 = vadd.s32 1, %v851_v23 }
  0xdf   :  { %v577_v18 = vadd.s32 1, %v855_v34 }
  0xe0   :  { %v350_v14 = vsub.s32 32, %v349_v45  ;;  %v352_v15 = vshll.u32 %v992_v31, %v349_v45  ;;  %v355_v28 = vshll.u32 %v993_v33, %v349_v45  ;;  %v358_v29 = vshll.u32 %v994_v35, %v349_v45 }
  0xe1   :  { %v361_v30 = vshll.u32 %v995_v37, %v349_v45  ;;  %v364_v32 = vshll.u32 %v996_v43, %v349_v45  ;;  %vm367_vm9 = vcmp.lt.s32.totalorder %v348_v25, 1  ;;  %vm368_vm10 = vcmp.lt.s32.totalorder %v348_v25, 2 }
  0xe2   :  { %v351_v36 = vshrl.u32 %v992_v31, %v350_v14  ;;  %v353_v41 = vshrl.u32 %v993_v33, %v350_v14  ;;  %v356_v47 = vshrl.u32 %v994_v35, %v350_v14  ;;  %v359_v48 = vshrl.u32 %v995_v37, %v350_v14 }
  0xe3   :  { %v362_v22 = vshrl.u32 %v996_v43, %v350_v14  ;;  %v365_v49 = vshrl.u32 %v997_v50, %v350_v14  ;;  %vm370_vm11 = vcmp.lt.s32.totalorder %v348_v25, 4  ;;  %vm463_vm12 = vcmp.gt.s32.totalorder %v462_v27, 0 }
  0xe4   :  { %v354_v51 = vor.u32 %v353_v41, %v352_v15  ;;  %v357_v46 = vor.u32 %v356_v47, %v355_v28  ;;  %v360_v52 = vor.u32 %v359_v48, %v358_v29  ;;  %vm369_vm13 = vcmp.lt.s32.totalorder %v348_v25, 3 }
  0xe5   :  { %v363_v55 = vor.u32 %v362_v22, %v361_v30  ;;  %v366_v56 = vor.u32 %v365_v49, %v364_v32  ;;  %v464_v63 = vsel %vm463_vm12, %v462_v27, 0  ;;  %vm578_vm3 = vcmp.gt.s32.totalorder %v577_v18, 0 }
  0xe6   :  { %v371_v0 = vsel %vm367_vm9, %v351_v36, %v354_v51  ;;  %v372_v1 = vsel %vm370_vm11, %v360_v52, 2102212464  ;;  %v375_v2 = vsel %vm367_vm9, %v354_v51, %v357_v46  ;;  %v379_v3 = vsel %vm367_vm9, %v357_v46, %v360_v52 }
  0xe7   :  { %v373_v4 = vsel %vm369_vm13, %v357_v46, %v372_v1  ;;  %v376_v5 = vsel %vm370_vm11, %v363_v55, 920167782  ;;  %v380_v6 = vsel %vm370_vm11, %v366_v56, 1326507024  ;;  %v465_v62 = vshrl.u32 %v464_v63, 5 }
  0xe8   :  { %v377_v10 = vsel %vm369_vm13, %v360_v52, %v376_v5  ;;  %v381_v11 = vsel %vm369_vm13, %v363_v55, %v380_v6  ;;  %v466_v19 = vand.u32 31, %v464_v63  ;;  %v374_v12 = vsel %vm368_vm10, %v371_v0, %v373_v4 }
  0xe9   :  { %v378_v13 = vsel %vm368_vm10, %v375_v2, %v377_v10  ;;  %v382_v16 = vsel %vm368_vm10, %v379_v3, %v381_v11  ;;  %v390_v25 = vmul.u32 %v1133_v26, %v374_v12  ;;  %vm484_vm14 = vcmp.lt.s32.totalorder %v465_v62, 1 }
  0xea   :  { %v1158_v20 = vmul.u32.u64.low %v1133_v26, %v382_v16  ;;  %v1159_v21 = vmul.u32.u64.high %v1133_v26, %v382_v16, %v1158_v20  ;;  %v1162_v23 = vmul.u32.u64.low %v1133_v26, %v378_v13  ;;  %v1163_v24 = vmul.u32.u64.high %v1133_v26, %v378_v13, %v1162_v23 }
  0xeb   :  { %v467_v45 = vsub.s32 32, %v466_v19  ;;  %v469_v61 = vshll.u32 %v992_v31, %v466_v19  ;;  %v472_v27 = vshll.u32 %v993_v33, %v466_v19  ;;  %v475_v14 = vshll.u32 %v994_v35, %v466_v19 }
  0xec   :  { %v478_v15 = vshll.u32 %v995_v37, %v466_v19  ;;  %v481_v28 = vshll.u32 %v996_v43, %v466_v19  ;;  %vm485_vm15 = vcmp.lt.s32.totalorder %v465_v62, 2  ;;  %vm392_vm0 = vc.u32 %v1159_v21, %v1162_v23 }
  0xed   :  { %v470_v29 = vshrl.u32 %v993_v33, %v467_v45  ;;  %v473_v30 = vshrl.u32 %v994_v35, %v467_v45  ;;  %v476_v32 = vshrl.u32 %v995_v37, %v467_v45  ;;  %v393_v34 = vadd.s32 1, %v1163_v24 }
  0xee   :  { %v468_v36 = vshrl.u32 %v992_v31, %v467_v45  ;;  %v479_v26 = vshrl.u32 %v996_v43, %v467_v45  ;;  %v482_v22 = vshrl.u32 %v997_v50, %v467_v45  ;;  %vm486_vm1 = vcmp.lt.s32.totalorder %v465_v62, 3 }
  0xef   :  { %v471_v41 = vor.u32 %v470_v29, %v469_v61  ;;  %v474_v47 = vor.u32 %v473_v30, %v472_v27  ;;  %v477_v48 = vor.u32 %v476_v32, %v475_v14  ;;  %v394_v49 = vsel %vm392_vm0, %v393_v34, %v1163_v24 }
  0xf0   :  { %v480_v51 = vor.u32 %v479_v26, %v478_v15  ;;  %vm487_vm2 = vcmp.lt.s32.totalorder %v465_v62, 4  ;;  %v395_v46 = vadd.s32 %v394_v49, %v390_v25  ;;  %v483_v52 = vor.u32 %v482_v22, %v481_v28 }
  0xf1   :  { %v489_v55 = vsel %vm487_vm2, %v477_v48, 2102212464  ;;  %v492_v56 = vsel %vm484_vm14, %v471_v41, %v474_v47  ;;  %v496_v0 = vsel %vm484_vm14, %v474_v47, %v477_v48  ;;  %v500_v1 = vshll.u32 %v460_v9, 8 }
  0xf2   :  { %v493_v63 = vsel %vm487_vm2, %v480_v51, 920167782  ;;  %v396_v2 = vadd.s32 536870912, %v395_v46  ;;  %v488_v3 = vsel %vm484_vm14, %v468_v36, %v471_v41  ;;  %v497_v5 = vsel %vm487_vm2, %v483_v52, 1326507024 }
  0xf3   :  { %v494_v4 = vsel %vm486_vm1, %v477_v48, %v493_v63  ;;  %v490_v6 = vsel %vm486_vm1, %v474_v47, %v489_v55  ;;  %v498_v11 = vsel %vm486_vm1, %v480_v51, %v497_v5  ;;  %v579_v19 = vsel %vm578_vm3, %v577_v18, 0 }
  0xf4   :  { %v495_v10 = vsel %vm485_vm15, %v492_v56, %v494_v4  ;;  %v1189_v12 = vshrl.u32 %v396_v2, 30  ;;  %v499_v13 = vsel %vm485_vm15, %v496_v0, %v498_v11  ;;  %v581_v45 = vand.u32 31, %v579_v19 }
  0xf5   :  { %v1192_v16 = vmul.u32.u64.low %v500_v1, %v495_v10  ;;  %v1193_v20 = vmul.u32.u64.high %v500_v1, %v495_v10, %v1192_v16  ;;  %v1196_v9 = vmul.u32.u64.low %v500_v1, %v499_v13  ;;  %v1197_v24 = vmul.u32.u64.high %v500_v1, %v499_v13, %v1196_v9 }
  0xf6   :  { %v398_v61 = vshll.u32 %v1189_v12, 30  ;;  %v491_v27 = vsel %vm485_vm15, %v488_v3, %v490_v6  ;;  %v582_v18 = vsub.s32 32, %v581_v45 }
  0xf7   :  { %952 = shalt.err (!%p949_p9)
}
  0xf8   :  { %826 = dma.vmem_to_hbm [thread:$0]  %s821_s1, 384, %s1341_s3, [#allocation7], %s988_s15, %s988_s15, %s989_s16   ;;  %v399_v14 = vsub.s32 %v395_v46, %v398_v61  ;;  %v510_v62 = vadd.s32 1, %v1193_v20  ;;  %v507_v25 = vmul.u32 %v500_v1, %v491_v27  ;;  %vm509_vm4 = vc.u32 %v1197_v24, %v1192_v16 }
  0xf9   :  { %v593_v29 = vshll.u32 %v995_v37, %v581_v45  ;;  %v567_v32 = vand.u32 2147483647, %v1128_v54  ;;  %v1213_v34 = vshrl.u32 %v579_v19, 5  ;;  %v594_v36 = vshrl.u32 %v996_v43, %v582_v18  ;;  %s999_s3 = smov [#allocation5]  }
  0xfa   :  { %v401_v15 = vsub.s32 0, %v399_v14  ;;  %v511_v28 = vsel %vm509_vm4, %v510_v62, %v1193_v20  ;;  %v584_v41 = vshll.u32 %v992_v31, %v581_v45  ;;  %v585_v47 = vshrl.u32 %v993_v33, %v582_v18  ;;  %s808_s24 = sshll.u32 %s999_s3, 4  ;;  %s809_s24 = int_to_ptr.vmem [resolvable:$true] %s808_s24 }
  0xfb   :  { %v512_v30 = vadd.s32 %v511_v28, %v507_v25  ;;  %v587_v48 = vshll.u32 %v993_v33, %v581_v45  ;;  %v588_v49 = vshrl.u32 %v994_v35, %v582_v18  ;;  %v590_v51 = vshll.u32 %v994_v35, %v581_v45  ;;  %s961_s25 = scalar_lea.vmem %s809_s24, 768  ;;  %p966_p11 = scmp.lt.s32.totalorder %s809_s24, %s809_s24 }
  0xfc   :  { %v848_v26 = vmin.u32 %v401_v15, %v399_v14  ;;  %v591_v46 = vshrl.u32 %v995_v37, %v582_v18  ;;  %v595_v55 = vor.u32 %v594_v36, %v593_v29  ;;  %v596_v56 = vshll.u32 %v996_v43, %v581_v45  ;;  %p962_p10 = scmp.ne.s32.totalorder %s809_s24, %s961_s25  ;;  %p967_p12 = scmp.lt.s32.totalorder %s961_s25, %s961_s25 }
  0xfd   :  { %v513_v22 = vadd.s32 536870912, %v512_v30  ;;  %v574_v0 = vand.u32 8388607, %v567_v32  ;;  %v597_v1 = vshrl.u32 %v997_v50, %v582_v18  ;;  %v391_v33 = vadd.s32 %v1162_v23, %v1159_v21 }
  0xfe   :  { %v403_v52 = vclz %v848_v26  ;;  %v586_v3 = vor.u32 %v585_v47, %v584_v41  ;;  %vm602_vm5 = vcmp.lt.s32.totalorder %v1213_v34, 4  ;;  %v589_v37 = vor.u32 %v588_v49, %v587_v48  ;;  %p968_p13 = por %p967_p12, %p966_p11 }
  0xff   :  { %v1223_v63 = vshrl.u32 %v513_v22, 30  ;;  %v592_v4 = vor.u32 %v591_v46, %v590_v51  ;;  %vm599_vm6 = vcmp.lt.s32.totalorder %v1213_v34, 1  ;;  %v598_v43 = vor.u32 %v597_v1, %v596_v56 }
 0x100   :  { %v849_v2 = vadd.s32 4294967294, %v403_v52  ;;  %vm601_vm8 = vcmp.lt.s32.totalorder %v1213_v34, 3  ;;  %v608_v50 = vsel %vm602_vm5, %v595_v55, 920167782  ;;  %v575_v21 = vor.u32 8388608, %v574_v0  ;;  %p969_p0 = pnand %p968_p13, %p962_p10 }
 0x101   :  { %v515_v35 = vshll.u32 %v1223_v63, 30  ;;  %v583_v23 = vshrl.u32 %v992_v31, %v582_v18  ;;  %vm600_vm9 = vcmp.lt.s32.totalorder %v1213_v34, 2  ;;  %v607_v20 = vsel %vm599_vm6, %v586_v3, %v589_v37 }
 0x102   :  { %vm850_vm7 = vcmp.lt.s32.totalorder %v849_v2, 0  ;;  %v609_v9 = vsel %vm601_vm8, %v592_v4, %v608_v50  ;;  %v611_v45 = vsel %vm599_vm6, %v589_v37, %v592_v4  ;;  %v604_v31 = vsel %vm602_vm5, %v592_v4, 2102212464 }
 0x103   :  { %v406_v5 = vsel %vm850_vm7, 0, %v849_v2  ;;  %v516_v6 = vsub.s32 %v512_v30, %v515_v35  ;;  %v612_v18 = vsel %vm602_vm5, %v598_v43, 1326507024  ;;  %v615_v25 = vshll.u32 %v575_v21, 8 }
 0x104   :  { %v407_v10 = vsub.s32 32, %v406_v5  ;;  %v408_v11 = vshll.u32 %v399_v14, %v406_v5  ;;  %v411_v19 = vsub.s32 4294967266, %v406_v5  ;;  %v613_v62 = vsel %vm601_vm8, %v595_v55, %v612_v18 }
 0x105   :  { %v518_v13 = vsub.s32 0, %v516_v6  ;;  %v610_v29 = vsel %vm600_vm9, %v607_v20, %v609_v9  ;;  %v614_v30 = vsel %vm600_vm9, %v611_v45, %v613_v62  ;;  %v603_v26 = vsel %vm599_vm6, %v583_v23, %v586_v3 }
 0x106   :  { %v409_v61 = vshrl.u32 %v391_v33, %v407_v10  ;;  %v412_v27 = vadd.s32 127, %v411_v19  ;;  %v605_v41 = vsel %vm601_vm8, %v589_v37, %v604_v31  ;;  %vm337_vm10 = vcmp.lt.s32.totalorder %v1116_v7, 0 }
 0x107   :  { %v852_v14 = vmin.u32 %v518_v13, %v516_v6  ;;  %v1258_v22 = vmul.u32.u64.low %v615_v25, %v614_v30  ;;  %v1259_v49 = vmul.u32.u64.high %v615_v25, %v614_v30, %v1258_v22  ;;  %v606_v56 = vsel %vm600_vm9, %v603_v26, %v605_v41 }
 0x108   :  { %v410_v15 = vor.u32 %v409_v61, %v408_v11  ;;  %v413_v28 = vshll.u32 %v412_v27, 23  ;;  %v1261_v46 = vmul.u32.u64.low %v615_v25, %v610_v29  ;;  %v1262_v52 = vmul.u32.u64.high %v615_v25, %v610_v29, %v1261_v46 }
 0x109   :  { %v520_v36 = vclz %v852_v14  ;;  %v421_v1 = vsub.s32 4, %v1189_v12  ;;  %v508_v2 = vadd.s32 %v1192_v16, %v1197_v24  ;;  %vm1274_vm13 = vcmp.le.f32.partialorder %v335_v8, 0.7853982 }
 0x10a   :  { %v414_v47 = vor.u32 4788187, %v413_v28  ;;  %v417_v48 = vcvt.s32.f32 %v410_v15  ;;  %vm624_vm12 = vc.u32 %v1259_v49, %v1261_v46  ;;  %v625_v37 = vadd.s32 1, %v1262_v52 }
 0x10b   :  { %v853_v51 = vadd.s32 4294967294, %v520_v36  ;;  %v622_v43 = vmul.u32 %v615_v25, %v606_v56  ;;  %v422_v24 = vsel %vm337_vm10, %v421_v1, %v1189_v12  ;;  %vm454_vm0 = vcmp.lt.s32.totalorder %v1125_v53, 0 }
 0x10c   :  { %v415_v55 = vand.u32 2147483647, %v414_v47  ;;  %v626_v21 = vsel %vm624_vm12, %v625_v37, %v1262_v52  ;;  %v424_v9 = vsel %vm1274_vm13, 0, %v422_v24  ;;  %vm427_vm2 = vweird.f32 %v1116_v7 }
 0x10d   :  { %vm854_vm11 = vcmp.lt.s32.totalorder %v853_v51, 0  ;;  %v627_v16 = vadd.s32 %v626_v21, %v622_v43  ;;  %v428_v31 = vadd.s32 3, %v424_v9  ;;  %vm1295_vm4 = vcmp.le.f32.partialorder %v452_v17, 0.7853982 }
 0x10e   :  { %v418_v0 = vmul.f32 %v417_v48, %v415_v55  ;;  %v523_v33 = vsel %vm854_vm11, 0, %v853_v51  ;;  %v623_v52 = vadd.s32 %v1261_v46, %v1259_v49  ;;  %v538_v4 = vsub.s32 4, %v1223_v63 }
 0x10f   :  { %v524_v3 = vsub.s32 32, %v523_v33  ;;  %v528_v35 = vsub.s32 4294967266, %v523_v33  ;;  %v525_v10 = vshll.u32 %v516_v6, %v523_v33  ;;  %v628_v19 = vadd.s32 536870912, %v627_v16 }
 0x110   :  { %v419_v34 = vxor.u32 2147483648, %v418_v0  ;;  %v429_v25 = vand.u32 3, %v428_v31  ;;  %vm569_vm5 = vcmp.lt.s32.totalorder %v1128_v54, 0  ;;  %vm568_vm6 = vcmp.le.f32.partialorder %v567_v32, 0.7853982 }
 0x111   :  { %v526_v50 = vshrl.u32 %v508_v2, %v524_v3  ;;  %v529_v5 = vadd.s32 127, %v528_v35  ;;  %v629_v45 = vshrl.u32 %v628_v19, 30 }
 0x112   :  { %v420_v23 = vsel %vm337_vm10, %v419_v34, %v418_v0  ;;  %vm434_vm14 = vcmp.eq.s32.totalorder %v429_v25, 2  ;;  %vm431_vm15 = vcmp.eq.s32.totalorder %v429_v25, 0  ;;  %vm430_vm1 = vcmp.lt.s32.totalorder %v429_v25, 2 }
 0x113   :  { %v423_v8 = vsel %vm1274_vm13, %v1116_v7, %v420_v23  ;;  %v530_v11 = vshll.u32 %v529_v5, 23  ;;  %v527_v13 = vor.u32 %v526_v50, %v525_v10  ;;  %v630_v27 = vshll.u32 %v629_v45, 30 }
 0x114   :  { %905 = vcosq.f32 %v423_v8  ;;  %v539_v50 = vsel %vm454_vm0, %v538_v4, %v1223_v63  ;;  %vm544_vm10 = vweird.f32 %v1125_v53 }
 0x115   :  { %907 = vsinq.f32 %v423_v8  ;;  %v531_v20 = vor.u32 4788187, %v530_v11  ;;  %v534_v18 = vcvt.s32.f32 %v527_v13  ;;  %v631_v12 = vsub.s32 %v627_v16, %v630_v27 }
 0x116   :  { %v541_v21 = vsel %vm1295_vm4, 0, %v539_v50  ;;  %v653_v16 = vsub.s32 4, %v629_v45 }
 0x117   :  { %v532_v61 = vand.u32 2147483647, %v531_v20  ;;  %v633_v62 = vsub.s32 0, %v631_v12  ;;  %v545_v8 = vadd.s32 3, %v541_v21 }
 0x118   :  { %v654_v63 = vsel %vm569_vm5, %v653_v16, %v629_v45 }
 0x119   :  { %v535_v14 = vmul.f32 %v534_v18, %v532_v61  ;;  %v856_v15 = vmin.u32 %v633_v62, %v631_v12  ;;  %v546_v13 = vand.u32 3, %v545_v8  ;;  %v656_v61 = vsel %vm568_vm6, 0, %v654_v63 }
 0x11a   :  { %v660_v27 = vadd.s32 3, %v656_v61 }
 0x11b   :  { %v536_v6 = vxor.u32 2147483648, %v535_v14  ;;  %v635_v28 = vclz %v856_v15  ;;  %vm548_vm7 = vcmp.eq.s32.totalorder %v546_v13, 0  ;;  %vm551_vm8 = vcmp.eq.s32.totalorder %v546_v13, 2 }
 0x11c   :  { %vm547_vm9 = vcmp.lt.s32.totalorder %v546_v13, 2  ;;  %v661_v62 = vand.u32 3, %v660_v27 }
 0x11d   :  { %v857_v26 = vadd.s32 4294967294, %v635_v28  ;;  %v537_v47 = vsel %vm454_vm0, %v536_v6, %v535_v14  ;;  %v675_v28 = vrot.slane %v1029_v38, %v1091_v44  ;;  %v691_v38 = vrot.slane %v1047_v58, %v1091_v44 }
 0x11e   :  { %v540_v0 = vsel %vm1295_vm4, %v1125_v53, %v537_v47  ;;  %vm666_vm11 = vcmp.eq.s32.totalorder %v661_v62, 2  ;;  %vm663_vm12 = vcmp.eq.s32.totalorder %v661_v62, 0  ;;  %v708_v53 = vrot.slane %v1035_v42, %v1091_v44 }
 0x11f   :  { %vm858_vm3 = vcmp.lt.s32.totalorder %v857_v26, 0  ;;  %909 = vcosq.f32 %v540_v0  ;;  %vm662_vm13 = vcmp.lt.s32.totalorder %v661_v62, 2 }
 0x120   :  { %v638_v55 = vsel %vm858_vm3, 0, %v857_v26  ;;  %911 = vsinq.f32 %v540_v0 }
 0x121   :  { %v906_v29 = vpop.eup %905  ;;  %v639_v1 = vsub.s32 32, %v638_v55  ;;  %v643_v33 = vsub.s32 4294967266, %v638_v55  ;;  %v640_v2 = vshll.u32 %v631_v12, %v638_v55 }
 0x122   :  { %v908_v30 = vpop.eup %907  ;;  %v435_v36 = vxor.u32 2147483648, %v906_v29 }
 0x123   :  { %v432_v41 = vxor.u32 2147483648, %v908_v30  ;;  %v641_v3 = vshrl.u32 %v623_v52, %v639_v1  ;;  %v644_v35 = vadd.s32 127, %v643_v33 }
 0x124   :  { %v436_v48 = vsel %vm434_vm14, %v435_v36, %v908_v30  ;;  %v686_v36 = vrot.slane %v1031_v39, %v1091_v44  ;;  %vm659_vm14 = vweird.f32 %v1128_v54  ;;  %v702_v39 = vrot.slane %v1049_v59, %v1091_v44 }
 0x125   :  { %v433_v22 = vsel %vm431_vm15, %v906_v29, %v432_v41  ;;  %v642_v17 = vor.u32 %v641_v3, %v640_v2  ;;  %v645_v37 = vshll.u32 %v644_v35, 23  ;;  %v697_v41 = vrot.slane %v1033_v40, %v1091_v44 }
 0x126   :  { %v437_v56 = vsel %vm430_vm1, %v433_v22, %v436_v48  ;;  %v680_v48 = vrot.slane %v1045_v57, %v1091_v44  ;;  %v713_v40 = vrot.slane %v1051_v60, %v1091_v44 }
 0x127   :  { %v438_v7 = vsel %vm427_vm2, nan, %v437_v56  ;;  %v646_v34 = vor.u32 4788187, %v645_v37  ;;  %v649_v43 = vcvt.s32.f32 %v642_v17 }
 0x128   :  { %v439_v49 = vmax.f32 %v438_v7, 1e-07 }
 0x129   :  { %v647_v46 = vand.u32 2147483647, %v646_v34 }
 0x12a   :  { %913 = vrcp.f32 %v439_v49 }
 0x12b   :  { %v650_v5 = vmul.f32 %v649_v43, %v647_v46 }
 0x12c   :  { %v910_v11 = vpop.eup %909 }
 0x12d   :  { %v651_v23 = vxor.u32 2147483648, %v650_v5  ;;  %v912_v19 = vpop.eup %911  ;;  %v552_v9 = vxor.u32 2147483648, %v910_v11 }
 0x12e   :  { %v549_v20 = vxor.u32 2147483648, %v912_v19 }
 0x12f   :  { %v652_v24 = vsel %vm569_vm5, %v651_v23, %v650_v5  ;;  %v553_v12 = vsel %vm551_vm8, %v552_v9, %v912_v19 }
 0x130   :  { %v655_v10 = vsel %vm568_vm6, %v1128_v54, %v652_v24  ;;  %v550_v18 = vsel %vm548_vm7, %v910_v11, %v549_v20 }
 0x131   :  { %915 = vcosq.f32 %v655_v10  ;;  %v554_v32 = vsel %vm547_vm9, %v550_v18, %v553_v12 }
 0x132   :  { %917 = vsinq.f32 %v655_v10  ;;  %v555_v15 = vsel %vm544_vm10, nan, %v554_v32 }
 0x137   :  { %v914_v31 = vpop.eup %913 }
 0x138   :  { %v559_v14 = vrot.slane %v914_v31, %v1091_v44 }
 0x13a   :  { %v560_v29 = vmul.f32 %v559_v14, %v555_v15 }
 0x13c   :  { %v676_v52 = vmul.f32 %v675_v28, %v560_v29  ;;  %v687_v55 = vmul.f32 %v686_v36, %v560_v29  ;;  %v698_v56 = vmul.f32 %v697_v41, %v560_v29  ;;  %v709_v0 = vmul.f32 %v708_v53, %v560_v29 }
 0x13e   :  { %v916_v25 = vpop.eup %915 }
 0x13f   :  { %v918_v45 = vpop.eup %917  ;;  %v667_v6 = vxor.u32 2147483648, %v916_v25 }
 0x140   :  { %v664_v30 = vxor.u32 2147483648, %v918_v45 }
 0x141   :  { %v668_v26 = vsel %vm666_vm11, %v667_v6, %v918_v45 }
 0x142   :  { %v665_v47 = vsel %vm663_vm12, %v916_v25, %v664_v30 }
 0x143   :  { %v669_v22 = vsel %vm662_vm13, %v665_v47, %v668_v26 }
 0x144   :  { %v670_v51 = vsel %vm659_vm14, nan, %v669_v22 }
 0x145   :  { %v671_v42 = vmul.f32 %v670_v51, %v559_v14 }
 0x147   :  { %v681_v1 = vmul.f32 %v680_v48, %v671_v42  ;;  %v692_v57 = vmul.f32 %v691_v38, %v671_v42  ;;  %v703_v33 = vmul.f32 %v702_v39, %v671_v42  ;;  %v714_v7 = vmul.f32 %v713_v40, %v671_v42 }
 0x149   :  { %v682_v58 = vadd.f32 %v681_v1, %v676_v52  ;;  %v693_v2 = vadd.f32 %v692_v57, %v687_v55  ;;  %v704_v54 = vadd.f32 %v703_v33, %v698_v56  ;;  %v715_v3 = vadd.f32 %v714_v7, %v709_v0 }
 0x14b   :  { %v716_v35 = vmul.f32 %v682_v58, %v682_v58  ;;  %v717_v17 = vmul.f32 %v693_v2, %v693_v2  ;;  %v719_v59 = vmul.f32 %v704_v54, %v704_v54  ;;  %v721_v37 = vmul.f32 %v715_v3, %v715_v3 }
 0x14c   :  { %v728_v4 = vmul.f32 %v704_v54, %v693_v2  ;;  %v729_v60 = vmul.f32 %v715_v3, %v693_v2  ;;  %v730_v44 = vmul.f32 %v715_v3, %v704_v54  ;;  %v731_v34 = vmul.f32 %v715_v3, %v682_v58 }
 0x14d   :  { %v718_v49 = vadd.f32 %v717_v17, %v716_v35  ;;  %v732_v46 = vmul.f32 %v704_v54, %v682_v58  ;;  %v733_v43 = vmul.f32 %v693_v2, %v682_v58  ;;  %v734_v50 = vadd.f32 %v721_v37, %v719_v59 }
 0x14e   :  { %v738_v5 = vsub.f32 %v728_v4, %v731_v34  ;;  %v746_v21 = vadd.f32 %v731_v34, %v728_v4  ;;  %v750_v23 = vadd.f32 %v721_v37, %v717_v17 }
 0x14f   :  { %v720_v16 = vadd.f32 %v719_v59, %v718_v49  ;;  %v742_v24 = vadd.f32 %v732_v46, %v729_v60  ;;  %v755_v8 = vsub.f32 %v730_v44, %v733_v43 }
 0x151   :  { %v722_v10 = vadd.f32 %v721_v37, %v720_v16 }
 0x153   :  { %919 = vrcp.f32 %v722_v10 }
 0x160   :  { %v920_v11 = vpop.eup %919 }
 0x161   :  { %v724_v19 = vmul.f32 %v920_v11, %v722_v10 }
 0x163   :  { %v725_v63 = vsub.f32 2.0, %v724_v19 }
 0x165   :  { %v726_v13 = vmul.f32 %v920_v11, %v725_v63 }
 0x167   :  { %v727_v20 = vadd.f32 %v726_v13, %v726_v13 }
 0x169   :  { %v735_v9 = vmul.f32 %v734_v50, %v727_v20  ;;  %v739_v61 = vmul.f32 %v738_v5, %v727_v20  ;;  %v743_v27 = vmul.f32 %v742_v24, %v727_v20  ;;  %v747_v31 = vmul.f32 %v746_v21, %v727_v20 }
 0x16a   :  { %v751_v18 = vmul.f32 %v750_v23, %v727_v20  ;;  %v756_v12 = vmul.f32 %v755_v8, %v727_v20 }
 0x16b   :  { %v736_v32 = vsub.f32 1.0, %v735_v9  ;;  %741 = vst [vmem:[#allocation5 + $0x8] sm:$0xff] %v739_v61  ;;  %745 = vst [vmem:[#allocation5 + $0x10] sm:$0xff] %v743_v27 }
 0x16c   :  { %749 = vst [vmem:[#allocation5 + $0x18] sm:$0xff] %v747_v31  ;;  %v752_v14 = vsub.f32 1.0, %v751_v18  ;;  %758 = vst [vmem:[#allocation5 + $0x28] sm:$0xff] %v756_v12 }
 0x16d   :  { %737 = vst [vmem:[#allocation5] sm:$0xff] %v736_v32 }
 0x16e   :  { %754 = vst [vmem:[#allocation5 + $0x20] sm:$0xff] %v752_v14 }
 0x16f   :  { %972 = shalt.err (!%p969_p0)
}
 0x170   :  { %814 = dma.vmem_to_hbm [thread:$0]  %s809_s24, 768, %s1340_s2, [#allocation4], %s988_s15, %s988_s15, %s989_s16  }
 0x171   :  { %983 = dma.done.wait [#allocation4], 768  }
 0x172   :  { %984 = vsyncadd [#allocation4], 4294966528 }
 0x173   :  { %985 = dma.done.wait [#allocation7], 384  }
 0x174   :  { %986 = vsyncadd [#allocation7], 4294966912 }
 0x175   :  { %833 = vsyncpa [#allocation3], 1 }
 0x176   :  { %834 = vsyncpa [#allocation4], 1 }
 0x177   :  { %835 = vsyncpa [#allocation7], 1 }

</bundles_post_ra>
